<compile_context>
chip_gen: v7x
topology: tpu7x:2x2x1
jax: 0.10.0
libtpu: 0.0.40
codegen_flags: <defaults>
</compile_context>

<pallas_src>
import functools

import jax
import jax.numpy as jnp
from jax import lax
from jax.experimental import pallas as pl
from jax.experimental.pallas import tpu as pltpu


def _dino_kernel(temp_ref, center_ref, student_ref, teacher_ref,
                 loss_ref, csum_ref,
                 t_all, s_all, diag,
                 *, student_temp, n_crops, m_crops):
    """One (core_split, batch_tile) grid step.

    student_ref: (n_crops, TILE_B, D), teacher_ref: (m_crops, TILE_B, D)
    loss_ref:    (1, 1, 128)  resident partial-loss accumulator (per core split)
    csum_ref:    (1, 1, D)    resident raw-teacher-sum accumulator (per core split)
    t_all/s_all/diag: (TILE_B, D) f32 scratch, re-zeroed every tile.
    """
    t_idx = pl.program_id(1)

    # Zero the resident per-core-split accumulators on the first batch tile.
    @pl.when(t_idx == 0)
    def _():
        loss_ref[...] = jnp.zeros_like(loss_ref)
        csum_ref[...] = jnp.zeros_like(csum_ref)

    inv_tt = 1.0 / temp_ref[0]           # teacher temp: runtime scalar from SMEM
    inv_st = 1.0 / student_temp          # student temp: compile-time constant

    center = center_ref[...].astype(jnp.float32)             # (1, D)

    # Per-tile accumulators.
    t_all[...] = jnp.zeros_like(t_all)
    s_all[...] = jnp.zeros_like(s_all)
    diag[...] = jnp.zeros_like(diag)

    def teacher_softmax(i):
        t = (teacher_ref[i].astype(jnp.float32) - center) * inv_tt
        t = t - jnp.max(t, axis=-1, keepdims=True)
        e = jnp.exp(t)
        # approx reciprocal -> EUP slot; keeps the per-row divide off the 4-wide VALU.
        return e * pl.reciprocal(jnp.sum(e, axis=-1, keepdims=True), approx=True)

    def student_neg_log_softmax(j):
        s = student_ref[j].astype(jnp.float32) * inv_st
        s = s - jnp.max(s, axis=-1, keepdims=True)
        log_z = jnp.log(jnp.sum(jnp.exp(s), axis=-1, keepdims=True))
        return log_z - s                                      # -log_softmax

    k = min(m_crops, n_crops)            # diagonal (ti == si) pairs PyTorch skips

    # --- stream over crops: exactly one softmax / log-softmax per crop --------------
    def paired(i, carry):                # crops 0..k-1: contribute to both sums + diag
        ts = teacher_softmax(i)
        ns = student_neg_log_softmax(i)
        t_all[...] += ts
        s_all[...] += ns
        diag[...] += ts * ns
        return carry

    lax.fori_loop(0, k, paired, None, unroll=True)

    if m_crops > k:                      # leftover teacher crops (m > n)
        def extra_teacher(i, carry):
            t_all[...] += teacher_softmax(i)
            return carry
        lax.fori_loop(k, m_crops, extra_teacher, None, unroll=True)

    if n_crops > k:                      # leftover student crops (n > m)
        def extra_student(j, carry):
            s_all[...] += student_neg_log_softmax(j)
            return carry
        lax.fori_loop(k, n_crops, extra_student, None, unroll=True)

    # sum_{ti != si} sum_{b,d} t_soft[ti] * (-log_softmax(student[si]))
    #   = sum_{b,d} [ (sum_ti t_soft) * (sum_si nls) - sum_{i<k} t_soft[i]*nls[i] ]
    tile_partial = jnp.sum(t_all[...] * s_all[...] - diag[...])
    loss_ref[...] += tile_partial                              # broadcast over (1,1,128)

    # Raw teacher sum over crops & tile rows, for the center EMA (finalized in wrapper).
    csum_ref[...] += jnp.sum(teacher_ref[...].astype(jnp.float32),
                             axis=(0, 1), keepdims=True)


def _pick_tile_b(batch, cap):
    """Largest divisor of `batch` that is a multiple of 8 and <= cap; else full batch."""
    best = None
    for d in range(1, batch + 1):
        if batch % d == 0 and d % 8 == 0 and d <= cap:
            best = d
    return best if best is not None else batch


def dino_loss_pallas(student, teacher, center, teacher_temp,
                     student_temp=0.1, center_momentum=0.9, tile_b=None):
    """DINOLoss forward.  Returns (loss_scalar, new_center).

    student: (n_crops, batch, proj_dim); teacher: (m_crops, batch, proj_dim);
    center: (1, proj_dim).  student/teacher may be f32 or bf16 (compute is f32).
    """
    n_crops, batch, dim = student.shape
    m_crops, batch_t, dim_t = teacher.shape
    assert batch == batch_t and dim == dim_t
    assert center.shape == (1, dim)

    n_loss_terms = n_crops * m_crops - min(n_crops, m_crops)
    if n_loss_terms <= 0:
        raise ValueError("DINOLoss requires n_crops * m_crops > min(n_crops, m_crops)")

    in_bytes = jnp.dtype(student.dtype).itemsize

    # Batch tile sized so double-buffered inputs + f32 scratch stay ~24 MiB (v7x-safe).
    if tile_b is None:
        budget = 24 * 1024 * 1024
        per_row = 2 * (n_crops + m_crops) * dim * in_bytes + 3 * dim * 4
        tile_b = _pick_tile_b(batch, max(1, budget // max(per_row, 1)))
    else:
        tile_b = _pick_tile_b(batch, tile_b)

    num_tiles = batch // tile_b
    # Leading "parallel" axis lets v7x spread batch tiles over both TensorCores.
    num_splits = 2 if num_tiles % 2 == 0 else 1
    tiles_per_split = num_tiles // num_splits

    kernel = functools.partial(
        _dino_kernel,
        student_temp=float(student_temp),
        n_crops=n_crops, m_crops=m_crops)

    # teacher_temp is the schedule value (teacher_temp_sch.get()) passed as a scalar.
    temp_arr = jnp.asarray([teacher_temp], dtype=jnp.float32)

    def in_tile_map(c, t):
        return (0, c * tiles_per_split + t, 0)

    est_vmem = (2 * (n_crops + m_crops) * tile_b * dim * in_bytes
                + 3 * tile_b * dim * 4 + 8 * dim * 4)
    vmem_limit = int(min(max(2 * est_vmem, 32 * 1024 * 1024), 64 * 1024 * 1024))

    cost = pl.CostEstimate(
        flops=int(10 * (n_crops + m_crops) * batch * dim),
        transcendentals=int((n_crops + n_crops + m_crops) * batch * dim),
        bytes_accessed=int((n_crops + m_crops) * batch * dim * in_bytes + 2 * dim * 4),
    )

    loss_parts, csum_parts = pl.pallas_call(
        kernel,
        grid=(num_splits, tiles_per_split),
        in_specs=[
            pl.BlockSpec(memory_space=pltpu.MemorySpace.SMEM),          # teacher_temp
            pl.BlockSpec((1, dim), lambda c, t: (0, 0)),                # center
            pl.BlockSpec((n_crops, tile_b, dim), in_tile_map),          # student tile
            pl.BlockSpec((m_crops, tile_b, dim), in_tile_map),          # teacher tile
        ],
        out_specs=[
            pl.BlockSpec((1, 1, 128), lambda c, t: (c, 0, 0)),          # loss partials
            pl.BlockSpec((1, 1, dim), lambda c, t: (c, 0, 0)),          # center-sum partials
        ],
        out_shape=[
            jax.ShapeDtypeStruct((num_splits, 1, 128), jnp.float32),
            jax.ShapeDtypeStruct((num_splits, 1, dim), jnp.float32),
        ],
        scratch_shapes=[
            pltpu.VMEM((tile_b, dim), jnp.float32),   # t_all
            pltpu.VMEM((tile_b, dim), jnp.float32),   # s_all
            pltpu.VMEM((tile_b, dim), jnp.float32),   # diag
        ],
        compiler_params=pltpu.CompilerParams(
            dimension_semantics=("parallel", "arbitrary"),
            vmem_limit_bytes=vmem_limit),
        cost_estimate=cost,
    )(temp_arr, center, student, teacher)

    # Tiny epilogue in the wrapper: combine per-core partials, scale, and do the EMA.
    loss = jnp.sum(loss_parts[:, 0, 0]) / (batch * n_loss_terms)
    teacher_sum = jnp.sum(csum_parts[:, 0, :], axis=0, keepdims=True)   # (1, D)
    new_center = (center.astype(jnp.float32) * center_momentum
                  + teacher_sum * ((1.0 - center_momentum) / (m_crops * batch)))
    return loss, new_center


def dino_loss_ref(student, teacher, center, teacher_temp,
                  student_temp=0.1, center_momentum=0.9):
    """Pure-JAX reference mirroring the PyTorch forward."""
    n_crops, m_crops = student.shape[0], teacher.shape[0]
    loss = 0.0
    for ti in range(m_crops):
        for si in range(n_crops):
            if ti == si:
                continue
            s = student[si].astype(jnp.float32) / student_temp
            t = jax.nn.softmax(
                (teacher[ti].astype(jnp.float32) - center) / teacher_temp, axis=-1)
            ent = jnp.sum(-t * jax.nn.log_softmax(s, axis=-1), axis=-1)
            loss = loss + jnp.mean(ent)
    loss = loss / (n_crops * m_crops - min(n_crops, m_crops))
    flat = teacher.astype(jnp.float32).reshape(-1, teacher.shape[-1])
    new_center = (center * center_momentum
                  + jnp.mean(flat, axis=0, keepdims=True) * (1.0 - center_momentum))
    return loss, new_center


if __name__ == "__main__":
    key = jax.random.PRNGKey(0)
    k_s, k_t = jax.random.split(key)

    n_crops, m_crops, batch, proj_dim = 4, 2, 32, 256
    student = jax.random.normal(k_s, (n_crops, batch, proj_dim), dtype=jnp.float32)
    teacher = jax.random.normal(k_t, (m_crops, batch, proj_dim), dtype=jnp.float32)
    # register_buffer('center', torch.zeros(1, projection_dim))
    center = jnp.zeros((1, proj_dim), dtype=jnp.float32)
    # TODO(synk): LinearAnneal teacher_temp_sch has no Pallas equivalent; its scalar
    # output is passed in directly as an SMEM input.
    teacher_temp = 0.04

    # tile_b=8 -> 4 batch tiles -> grid (2, 2): exercises both the parallel core-split
    # axis and the resident-accumulator ("arbitrary") batch-tile axis.
    loss, new_center = dino_loss_pallas(student, teacher, center, teacher_temp,
                                        tile_b=8)
    loss = jax.block_until_ready(loss)
    new_center = jax.block_until_ready(new_center)

    ref_loss, ref_center = dino_loss_ref(student, teacher, center, teacher_temp)

    # Loose rtol on the loss: the kernel uses the EUP approx reciprocal for the softmax
    # normalizer (per v5e perf guidance), which is slightly lower precision than 1/x.
    assert jnp.allclose(loss, ref_loss, rtol=5e-3, atol=1e-5), (loss, ref_loss)
    assert jnp.allclose(new_center, ref_center, rtol=1e-4, atol=1e-6)

    print("KERNEL_OK")
</pallas_src>

<mosaic_0001>
module attributes {stable_mosaic.version = 11 : i64} {
  func.func @_dino_kernel(%arg0: i32, %arg1: i32, %arg2: memref<1xf32, #tpu.memory_space<smem>>, %arg3: memref<1x256xf32, #tpu.memory_space<vmem>>, %arg4: memref<4x8x256xf32, #tpu.memory_space<vmem>>, %arg5: memref<2x8x256xf32, #tpu.memory_space<vmem>>, %arg6: memref<1x1x128xf32, #tpu.memory_space<vmem>>, %arg7: memref<1x1x256xf32, #tpu.memory_space<vmem>>, %arg8: memref<8x256xf32, #tpu.memory_space<vmem>>, %arg9: memref<8x256xf32, #tpu.memory_space<vmem>>, %arg10: memref<8x256xf32, #tpu.memory_space<vmem>>) attributes {dimension_semantics = [#tpu.dimension_semantics<parallel>, #tpu.dimension_semantics<arbitrary>], iteration_bounds = array<i64: 2, 2>, scalar_prefetch = 0 : i64, scratch_operands = 3 : i64, tpu.core_type = #tpu.core_type<tc>, window_params = [{transform_indices = @transform_0, window_bounds = array<i64: 1>}, {pipeline_mode = #tpu.pipeline_mode<synchronous>, transform_indices = @transform_1, window_bounds = array<i64: 1, 256>}, {transform_indices = @transform_2, window_bounds = array<i64: 4, 8, 256>}, {transform_indices = @transform_3, window_bounds = array<i64: 2, 8, 256>}, {transform_indices = @transform_4, window_bounds = array<i64: 1, 1, 128>}, {transform_indices = @transform_5, window_bounds = array<i64: 1, 1, 256>}]} {
    %c0_i32 = arith.constant 0 : i32
    %0 = arith.cmpi eq, %arg1, %c0_i32 : i32
    %1 = arith.extui %0 : i1 to i32
    %c0_i32_0 = arith.constant 0 : i32
    %2 = arith.cmpi ne, %1, %c0_i32_0 : i32
    scf.if %2 {
      %cst_98 = arith.constant 0.000000e+00 : f32
      %151 = vector.broadcast %cst_98 : f32 to vector<1x1x128xf32>
      %c0_99 = arith.constant 0 : index
      %c0_100 = arith.constant 0 : index
      %c0_101 = arith.constant 0 : index
      %152 = vector.load %arg6[%c0_99, %c0_100, %c0_101] : memref<1x1x128xf32, #tpu.memory_space<vmem>>, vector<1x1x128xf32>
      tpu.vector_store %arg6[%c0_99, %c0_100, %c0_101], %151 {strides = array<i32>} : memref<1x1x128xf32, #tpu.memory_space<vmem>>, vector<1x1x128xf32>,
      %cst_102 = arith.constant 0.000000e+00 : f32
      %153 = vector.broadcast %cst_102 : f32 to vector<1x1x256xf32>
      %c0_103 = arith.constant 0 : index
      %c0_104 = arith.constant 0 : index
      %c0_105 = arith.constant 0 : index
      %154 = vector.load %arg7[%c0_103, %c0_104, %c0_105] : memref<1x1x256xf32, #tpu.memory_space<vmem>>, vector<1x1x256xf32>
      tpu.vector_store %arg7[%c0_103, %c0_104, %c0_105], %153 {strides = array<i32>} : memref<1x1x256xf32, #tpu.memory_space<vmem>>, vector<1x1x256xf32>,
    } else {
    }
    %c0 = arith.constant 0 : index
    %3 = memref.load %arg2[%c0] : memref<1xf32, #tpu.memory_space<smem>>
    %cst = arith.constant 1.000000e+00 : f32
    %4 = arith.divf %cst, %3 : f32
    %c0_1 = arith.constant 0 : index
    %c0_2 = arith.constant 0 : index
    %5 = vector.load %arg3[%c0_1, %c0_2] : memref<1x256xf32, #tpu.memory_space<vmem>>, vector<1x256xf32>
    %cst_3 = arith.constant 0.000000e+00 : f32
    %6 = vector.broadcast %cst_3 : f32 to vector<8x256xf32>
    %c0_4 = arith.constant 0 : index
    %c0_5 = arith.constant 0 : index
    %7 = vector.load %arg8[%c0_4, %c0_5] : memref<8x256xf32, #tpu.memory_space<vmem>>, vector<8x256xf32>
    tpu.vector_store %arg8[%c0_4, %c0_5], %6 {strides = array<i32>} : memref<8x256xf32, #tpu.memory_space<vmem>>, vector<8x256xf32>,
    %cst_6 = arith.constant 0.000000e+00 : f32
    %8 = vector.broadcast %cst_6 : f32 to vector<8x256xf32>
    %c0_7 = arith.constant 0 : index
    %c0_8 = arith.constant 0 : index
    %9 = vector.load %arg9[%c0_7, %c0_8] : memref<8x256xf32, #tpu.memory_space<vmem>>, vector<8x256xf32>
    tpu.vector_store %arg9[%c0_7, %c0_8], %8 {strides = array<i32>} : memref<8x256xf32, #tpu.memory_space<vmem>>, vector<8x256xf32>,
    %cst_9 = arith.constant 0.000000e+00 : f32
    %10 = vector.broadcast %cst_9 : f32 to vector<8x256xf32>
    %c0_10 = arith.constant 0 : index
    %c0_11 = arith.constant 0 : index
    %11 = vector.load %arg10[%c0_10, %c0_11] : memref<8x256xf32, #tpu.memory_space<vmem>>, vector<8x256xf32>
    tpu.vector_store %arg10[%c0_10, %c0_11], %10 {strides = array<i32>} : memref<8x256xf32, #tpu.memory_space<vmem>>, vector<8x256xf32>,
    %c0_i32_12 = arith.constant 0 : i32
    %12 = arith.index_cast %c0_i32_12 : i32 to index
    %c0_13 = arith.constant 0 : index
    %c0_14 = arith.constant 0 : index
    %13 = vector.load %arg5[%12, %c0_13, %c0_14] : memref<2x8x256xf32, #tpu.memory_space<vmem>>, vector<1x8x256xf32>
    %14 = vector.shape_cast %13 : vector<1x8x256xf32> to vector<8x256xf32>
    %15 = vector.broadcast %5 : vector<1x256xf32> to vector<8x256xf32>
    %16 = arith.subf %14, %15 : vector<8x256xf32>
    %17 = vector.broadcast %4 : f32 to vector<8x256xf32>
    %18 = arith.mulf %16, %17 : vector<8x256xf32>
    %cst_15 = arith.constant dense<0xFF800000> : vector<8xf32>
    %19 = vector.multi_reduction <maximumf>, %18, %cst_15 [1] : vector<8x256xf32> to vector<8xf32>
    %20 = vector.shape_cast %19 : vector<8xf32> to vector<8x1xf32>
    %21 = vector.broadcast %20 : vector<8x1xf32> to vector<8x256xf32>
    %22 = arith.subf %18, %21 : vector<8x256xf32>
    %23 = math.exp %22 : vector<8x256xf32>
    %cst_16 = arith.constant dense<0.000000e+00> : vector<8xf32>
    %24 = vector.multi_reduction <add>, %23, %cst_16 [1] : vector<8x256xf32> to vector<8xf32>
    %25 = vector.shape_cast %24 : vector<8xf32> to vector<8x1xf32>
    %26 = tpu.reciprocal %25 {approx = true} : vector<8x1xf32> -> vector<8x1xf32>
    %27 = vector.broadcast %26 : vector<8x1xf32> to vector<8x256xf32>
    %28 = arith.mulf %23, %27 : vector<8x256xf32>
    %29 = arith.index_cast %c0_i32_12 : i32 to index
    %c0_17 = arith.constant 0 : index
    %c0_18 = arith.constant 0 : index
    %30 = vector.load %arg4[%29, %c0_17, %c0_18] : memref<4x8x256xf32, #tpu.memory_space<vmem>>, vector<1x8x256xf32>
    %31 = vector.shape_cast %30 : vector<1x8x256xf32> to vector<8x256xf32>
    %cst_19 = arith.constant 1.000000e+01 : f32
    %32 = vector.broadcast %cst_19 : f32 to vector<8x256xf32>
    %33 = arith.mulf %31, %32 : vector<8x256xf32>
    %cst_20 = arith.constant dense<0xFF800000> : vector<8xf32>
    %34 = vector.multi_reduction <maximumf>, %33, %cst_20 [1] : vector<8x256xf32> to vector<8xf32>
    %35 = vector.shape_cast %34 : vector<8xf32> to vector<8x1xf32>
    %36 = vector.broadcast %35 : vector<8x1xf32> to vector<8x256xf32>
    %37 = arith.subf %33, %36 : vector<8x256xf32>
    %38 = math.exp %37 : vector<8x256xf32>
    %cst_21 = arith.constant dense<0.000000e+00> : vector<8xf32>
    %39 = vector.multi_reduction <add>, %38, %cst_21 [1] : vector<8x256xf32> to vector<8xf32>
    %40 = vector.shape_cast %39 : vector<8xf32> to vector<8x1xf32>
    %41 = math.log %40 : vector<8x1xf32>
    %42 = vector.broadcast %41 : vector<8x1xf32> to vector<8x256xf32>
    %43 = arith.subf %42, %37 : vector<8x256xf32>
    %c0_22 = arith.constant 0 : index
    %c0_23 = arith.constant 0 : index
    %44 = vector.load %arg8[%c0_22, %c0_23] : memref<8x256xf32, #tpu.memory_space<vmem>>, vector<8x256xf32>
    %45 = arith.addf %44, %28 : vector<8x256xf32>
    %c0_24 = arith.constant 0 : index
    %c0_25 = arith.constant 0 : index
    %46 = vector.load %arg8[%c0_24, %c0_25] : memref<8x256xf32, #tpu.memory_space<vmem>>, vector<8x256xf32>
    tpu.vector_store %arg8[%c0_24, %c0_25], %45 {strides = array<i32>} : memref<8x256xf32, #tpu.memory_space<vmem>>, vector<8x256xf32>,
    %c0_26 = arith.constant 0 : index
    %c0_27 = arith.constant 0 : index
    %47 = vector.load %arg9[%c0_26, %c0_27] : memref<8x256xf32, #tpu.memory_space<vmem>>, vector<8x256xf32>
    %48 = arith.addf %47, %43 : vector<8x256xf32>
    %c0_28 = arith.constant 0 : index
    %c0_29 = arith.constant 0 : index
    %49 = vector.load %arg9[%c0_28, %c0_29] : memref<8x256xf32, #tpu.memory_space<vmem>>, vector<8x256xf32>
    tpu.vector_store %arg9[%c0_28, %c0_29], %48 {strides = array<i32>} : memref<8x256xf32, #tpu.memory_space<vmem>>, vector<8x256xf32>,
    %c0_30 = arith.constant 0 : index
    %c0_31 = arith.constant 0 : index
    %50 = vector.load %arg10[%c0_30, %c0_31] : memref<8x256xf32, #tpu.memory_space<vmem>>, vector<8x256xf32>
    %51 = arith.mulf %28, %43 : vector<8x256xf32>
    %52 = arith.addf %50, %51 : vector<8x256xf32>
    %c0_32 = arith.constant 0 : index
    %c0_33 = arith.constant 0 : index
    %53 = vector.load %arg10[%c0_32, %c0_33] : memref<8x256xf32, #tpu.memory_space<vmem>>, vector<8x256xf32>
    tpu.vector_store %arg10[%c0_32, %c0_33], %52 {strides = array<i32>} : memref<8x256xf32, #tpu.memory_space<vmem>>, vector<8x256xf32>,
    %c1_i32 = arith.constant 1 : i32
    %54 = arith.index_cast %c1_i32 : i32 to index
    %c0_34 = arith.constant 0 : index
    %c0_35 = arith.constant 0 : index
    %55 = vector.load %arg5[%54, %c0_34, %c0_35] : memref<2x8x256xf32, #tpu.memory_space<vmem>>, vector<1x8x256xf32>
    %56 = vector.shape_cast %55 : vector<1x8x256xf32> to vector<8x256xf32>
    %57 = vector.broadcast %5 : vector<1x256xf32> to vector<8x256xf32>
    %58 = arith.subf %56, %57 : vector<8x256xf32>
    %59 = vector.broadcast %4 : f32 to vector<8x256xf32>
    %60 = arith.mulf %58, %59 : vector<8x256xf32>
    %cst_36 = arith.constant dense<0xFF800000> : vector<8xf32>
    %61 = vector.multi_reduction <maximumf>, %60, %cst_36 [1] : vector<8x256xf32> to vector<8xf32>
    %62 = vector.shape_cast %61 : vector<8xf32> to vector<8x1xf32>
    %63 = vector.broadcast %62 : vector<8x1xf32> to vector<8x256xf32>
    %64 = arith.subf %60, %63 : vector<8x256xf32>
    %65 = math.exp %64 : vector<8x256xf32>
    %cst_37 = arith.constant dense<0.000000e+00> : vector<8xf32>
    %66 = vector.multi_reduction <add>, %65, %cst_37 [1] : vector<8x256xf32> to vector<8xf32>
    %67 = vector.shape_cast %66 : vector<8xf32> to vector<8x1xf32>
    %68 = tpu.reciprocal %67 {approx = true} : vector<8x1xf32> -> vector<8x1xf32>
    %69 = vector.broadcast %68 : vector<8x1xf32> to vector<8x256xf32>
    %70 = arith.mulf %65, %69 : vector<8x256xf32>
    %71 = arith.index_cast %c1_i32 : i32 to index
    %c0_38 = arith.constant 0 : index
    %c0_39 = arith.constant 0 : index
    %72 = vector.load %arg4[%71, %c0_38, %c0_39] : memref<4x8x256xf32, #tpu.memory_space<vmem>>, vector<1x8x256xf32>
    %73 = vector.shape_cast %72 : vector<1x8x256xf32> to vector<8x256xf32>
    %cst_40 = arith.constant 1.000000e+01 : f32
    %74 = vector.broadcast %cst_40 : f32 to vector<8x256xf32>
    %75 = arith.mulf %73, %74 : vector<8x256xf32>
    %cst_41 = arith.constant dense<0xFF800000> : vector<8xf32>
    %76 = vector.multi_reduction <maximumf>, %75, %cst_41 [1] : vector<8x256xf32> to vector<8xf32>
    %77 = vector.shape_cast %76 : vector<8xf32> to vector<8x1xf32>
    %78 = vector.broadcast %77 : vector<8x1xf32> to vector<8x256xf32>
    %79 = arith.subf %75, %78 : vector<8x256xf32>
    %80 = math.exp %79 : vector<8x256xf32>
    %cst_42 = arith.constant dense<0.000000e+00> : vector<8xf32>
    %81 = vector.multi_reduction <add>, %80, %cst_42 [1] : vector<8x256xf32> to vector<8xf32>
    %82 = vector.shape_cast %81 : vector<8xf32> to vector<8x1xf32>
    %83 = math.log %82 : vector<8x1xf32>
    %84 = vector.broadcast %83 : vector<8x1xf32> to vector<8x256xf32>
    %85 = arith.subf %84, %79 : vector<8x256xf32>
    %c0_43 = arith.constant 0 : index
    %c0_44 = arith.constant 0 : index
    %86 = vector.load %arg8[%c0_43, %c0_44] : memref<8x256xf32, #tpu.memory_space<vmem>>, vector<8x256xf32>
    %87 = arith.addf %86, %70 : vector<8x256xf32>
    %c0_45 = arith.constant 0 : index
    %c0_46 = arith.constant 0 : index
    %88 = vector.load %arg8[%c0_45, %c0_46] : memref<8x256xf32, #tpu.memory_space<vmem>>, vector<8x256xf32>
    tpu.vector_store %arg8[%c0_45, %c0_46], %87 {strides = array<i32>} : memref<8x256xf32, #tpu.memory_space<vmem>>, vector<8x256xf32>,
    %c0_47 = arith.constant 0 : index
    %c0_48 = arith.constant 0 : index
    %89 = vector.load %arg9[%c0_47, %c0_48] : memref<8x256xf32, #tpu.memory_space<vmem>>, vector<8x256xf32>
    %90 = arith.addf %89, %85 : vector<8x256xf32>
    %c0_49 = arith.constant 0 : index
    %c0_50 = arith.constant 0 : index
    %91 = vector.load %arg9[%c0_49, %c0_50] : memref<8x256xf32, #tpu.memory_space<vmem>>, vector<8x256xf32>
    tpu.vector_store %arg9[%c0_49, %c0_50], %90 {strides = array<i32>} : memref<8x256xf32, #tpu.memory_space<vmem>>, vector<8x256xf32>,
    %c0_51 = arith.constant 0 : index
    %c0_52 = arith.constant 0 : index
    %92 = vector.load %arg10[%c0_51, %c0_52] : memref<8x256xf32, #tpu.memory_space<vmem>>, vector<8x256xf32>
    %93 = arith.mulf %70, %85 : vector<8x256xf32>
    %94 = arith.addf %92, %93 : vector<8x256xf32>
    %c0_53 = arith.constant 0 : index
    %c0_54 = arith.constant 0 : index
    %95 = vector.load %arg10[%c0_53, %c0_54] : memref<8x256xf32, #tpu.memory_space<vmem>>, vector<8x256xf32>
    tpu.vector_store %arg10[%c0_53, %c0_54], %94 {strides = array<i32>} : memref<8x256xf32, #tpu.memory_space<vmem>>, vector<8x256xf32>,
    %c2_i32 = arith.constant 2 : i32
    %c2_i32_55 = arith.constant 2 : i32
    %c0_56 = arith.constant 0 : index
    %c0_57 = arith.constant 0 : index
    %96 = vector.load %arg9[%c0_56, %c0_57] : memref<8x256xf32, #tpu.memory_space<vmem>>, vector<8x256xf32>
    %97 = arith.index_cast %c2_i32_55 : i32 to index
    %c0_58 = arith.constant 0 : index
    %c0_59 = arith.constant 0 : index
    %98 = vector.load %arg4[%97, %c0_58, %c0_59] : memref<4x8x256xf32, #tpu.memory_space<vmem>>, vector<1x8x256xf32>
    %99 = vector.shape_cast %98 : vector<1x8x256xf32> to vector<8x256xf32>
    %cst_60 = arith.constant 1.000000e+01 : f32
    %100 = vector.broadcast %cst_60 : f32 to vector<8x256xf32>
    %101 = arith.mulf %99, %100 : vector<8x256xf32>
    %cst_61 = arith.constant dense<0xFF800000> : vector<8xf32>
    %102 = vector.multi_reduction <maximumf>, %101, %cst_61 [1] : vector<8x256xf32> to vector<8xf32>
    %103 = vector.shape_cast %102 : vector<8xf32> to vector<8x1xf32>
    %104 = vector.broadcast %103 : vector<8x1xf32> to vector<8x256xf32>
    %105 = arith.subf %101, %104 : vector<8x256xf32>
    %106 = math.exp %105 : vector<8x256xf32>
    %cst_62 = arith.constant dense<0.000000e+00> : vector<8xf32>
    %107 = vector.multi_reduction <add>, %106, %cst_62 [1] : vector<8x256xf32> to vector<8xf32>
    %108 = vector.shape_cast %107 : vector<8xf32> to vector<8x1xf32>
    %109 = math.log %108 : vector<8x1xf32>
    %110 = vector.broadcast %109 : vector<8x1xf32> to vector<8x256xf32>
    %111 = arith.subf %110, %105 : vector<8x256xf32>
    %112 = arith.addf %96, %111 : vector<8x256xf32>
    %c0_63 = arith.constant 0 : index
    %c0_64 = arith.constant 0 : index
    %113 = vector.load %arg9[%c0_63, %c0_64] : memref<8x256xf32, #tpu.memory_space<vmem>>, vector<8x256xf32>
    tpu.vector_store %arg9[%c0_63, %c0_64], %112 {strides = array<i32>} : memref<8x256xf32, #tpu.memory_space<vmem>>, vector<8x256xf32>,
    %c3_i32 = arith.constant 3 : i32
    %c0_65 = arith.constant 0 : index
    %c0_66 = arith.constant 0 : index
    %114 = vector.load %arg9[%c0_65, %c0_66] : memref<8x256xf32, #tpu.memory_space<vmem>>, vector<8x256xf32>
    %115 = arith.index_cast %c3_i32 : i32 to index
    %c0_67 = arith.constant 0 : index
    %c0_68 = arith.constant 0 : index
    %116 = vector.load %arg4[%115, %c0_67, %c0_68] : memref<4x8x256xf32, #tpu.memory_space<vmem>>, vector<1x8x256xf32>
    %117 = vector.shape_cast %116 : vector<1x8x256xf32> to vector<8x256xf32>
    %cst_69 = arith.constant 1.000000e+01 : f32
    %118 = vector.broadcast %cst_69 : f32 to vector<8x256xf32>
    %119 = arith.mulf %117, %118 : vector<8x256xf32>
    %cst_70 = arith.constant dense<0xFF800000> : vector<8xf32>
    %120 = vector.multi_reduction <maximumf>, %119, %cst_70 [1] : vector<8x256xf32> to vector<8xf32>
    %121 = vector.shape_cast %120 : vector<8xf32> to vector<8x1xf32>
    %122 = vector.broadcast %121 : vector<8x1xf32> to vector<8x256xf32>
    %123 = arith.subf %119, %122 : vector<8x256xf32>
    %124 = math.exp %123 : vector<8x256xf32>
    %cst_71 = arith.constant dense<0.000000e+00> : vector<8xf32>
    %125 = vector.multi_reduction <add>, %124, %cst_71 [1] : vector<8x256xf32> to vector<8xf32>
    %126 = vector.shape_cast %125 : vector<8xf32> to vector<8x1xf32>
    %127 = math.log %126 : vector<8x1xf32>
    %128 = vector.broadcast %127 : vector<8x1xf32> to vector<8x256xf32>
    %129 = arith.subf %128, %123 : vector<8x256xf32>
    %130 = arith.addf %114, %129 : vector<8x256xf32>
    %c0_72 = arith.constant 0 : index
    %c0_73 = arith.constant 0 : index
    %131 = vector.load %arg9[%c0_72, %c0_73] : memref<8x256xf32, #tpu.memory_space<vmem>>, vector<8x256xf32>
    tpu.vector_store %arg9[%c0_72, %c0_73], %130 {strides = array<i32>} : memref<8x256xf32, #tpu.memory_space<vmem>>, vector<8x256xf32>,
    %c2_i32_74 = arith.constant 2 : i32
    %c0_75 = arith.constant 0 : index
    %c0_76 = arith.constant 0 : index
    %132 = vector.load %arg8[%c0_75, %c0_76] : memref<8x256xf32, #tpu.memory_space<vmem>>, vector<8x256xf32>
    %c0_77 = arith.constant 0 : index
    %c0_78 = arith.constant 0 : index
    %133 = vector.load %arg9[%c0_77, %c0_78] : memref<8x256xf32, #tpu.memory_space<vmem>>, vector<8x256xf32>
    %134 = arith.mulf %132, %133 : vector<8x256xf32>
    %c0_79 = arith.constant 0 : index
    %c0_80 = arith.constant 0 : index
    %135 = vector.load %arg10[%c0_79, %c0_80] : memref<8x256xf32, #tpu.memory_space<vmem>>, vector<8x256xf32>
    %136 = arith.subf %134, %135 : vector<8x256xf32>
    %137 = vector.shape_cast %136 : vector<8x256xf32> to vector<1x8x256xf32>
    %cst_81 = arith.constant dense<0.000000e+00> : vector<1xf32>
    %138 = vector.multi_reduction <add>, %137, %cst_81 [1, 2] : vector<1x8x256xf32> to vector<1xf32>
    %139 = vector.shape_cast %138 : vector<1xf32> to vector<1x1x1xf32>
    %140 = vector.extract %139[0, 0, 0] : f32 from vector<1x1x1xf32>
    %c0_82 = arith.constant 0 : index
    %c0_83 = arith.constant 0 : index
    %c0_84 = arith.constant 0 : index
    %141 = vector.load %arg6[%c0_82, %c0_83, %c0_84] : memref<1x1x128xf32, #tpu.memory_space<vmem>>, vector<1x1x128xf32>
    %142 = vector.broadcast %140 : f32 to vector<1x1x128xf32>
    %143 = arith.addf %141, %142 : vector<1x1x128xf32>
    %c0_85 = arith.constant 0 : index
    %c0_86 = arith.constant 0 : index
    %c0_87 = arith.constant 0 : index
    %144 = vector.load %arg6[%c0_85, %c0_86, %c0_87] : memref<1x1x128xf32, #tpu.memory_space<vmem>>, vector<1x1x128xf32>
    tpu.vector_store %arg6[%c0_85, %c0_86, %c0_87], %143 {strides = array<i32>} : memref<1x1x128xf32, #tpu.memory_space<vmem>>, vector<1x1x128xf32>,
    %c0_88 = arith.constant 0 : index
    %c0_89 = arith.constant 0 : index
    %c0_90 = arith.constant 0 : index
    %145 = vector.load %arg7[%c0_88, %c0_89, %c0_90] : memref<1x1x256xf32, #tpu.memory_space<vmem>>, vector<1x1x256xf32>
    %c0_91 = arith.constant 0 : index
    %c0_92 = arith.constant 0 : index
    %c0_93 = arith.constant 0 : index
    %146 = vector.load %arg5[%c0_91, %c0_92, %c0_93] : memref<2x8x256xf32, #tpu.memory_space<vmem>>, vector<2x8x256xf32>
    %cst_94 = arith.constant dense<0.000000e+00> : vector<256xf32>
    %147 = vector.multi_reduction <add>, %146, %cst_94 [0, 1] : vector<2x8x256xf32> to vector<256xf32>
    %148 = vector.shape_cast %147 : vector<256xf32> to vector<1x1x256xf32>
    %149 = arith.addf %145, %148 : vector<1x1x256xf32>
    %c0_95 = arith.constant 0 : index
    %c0_96 = arith.constant 0 : index
    %c0_97 = arith.constant 0 : index
    %150 = vector.load %arg7[%c0_95, %c0_96, %c0_97] : memref<1x1x256xf32, #tpu.memory_space<vmem>>, vector<1x1x256xf32>
    tpu.vector_store %arg7[%c0_95, %c0_96, %c0_97], %149 {strides = array<i32>} : memref<1x1x256xf32, #tpu.memory_space<vmem>>, vector<1x1x256xf32>,
    return
  }
  func.func @transform_0(%arg0: i32, %arg1: i32) -> i32 {
    %c0_i32 = arith.constant 0 : i32
    %c0_i32_0 = arith.constant 0 : i32
    return %c0_i32 : i32
  }
  func.func @transform_1(%arg0: i32, %arg1: i32) -> (i32, i32) {
    %c0_i32 = arith.constant 0 : i32
    %c0_i32_0 = arith.constant 0 : i32
    %c0_i32_1 = arith.constant 0 : i32
    return %c0_i32, %c0_i32_0 : i32, i32
  }
  func.func @transform_2(%arg0: i32, %arg1: i32) -> (i32, i32, i32) {
    %c2_i32 = arith.constant 2 : i32
    %0 = arith.muli %arg0, %c2_i32 : i32
    %1 = arith.addi %0, %arg1 : i32
    %c0_i32 = arith.constant 0 : i32
    %c0_i32_0 = arith.constant 0 : i32
    %c0_i32_1 = arith.constant 0 : i32
    return %c0_i32, %1, %c0_i32_0 : i32, i32, i32
  }
  func.func @transform_3(%arg0: i32, %arg1: i32) -> (i32, i32, i32) {
    %c2_i32 = arith.constant 2 : i32
    %0 = arith.muli %arg0, %c2_i32 : i32
    %1 = arith.addi %0, %arg1 : i32
    %c0_i32 = arith.constant 0 : i32
    %c0_i32_0 = arith.constant 0 : i32
    %c0_i32_1 = arith.constant 0 : i32
    return %c0_i32, %1, %c0_i32_0 : i32, i32, i32
  }
  func.func @transform_4(%arg0: i32, %arg1: i32) -> (i32, i32, i32) {
    %c0_i32 = arith.constant 0 : i32
    %c0_i32_0 = arith.constant 0 : i32
    %c0_i32_1 = arith.constant 0 : i32
    return %arg0, %c0_i32, %c0_i32_0 : i32, i32, i32
  }
  func.func @transform_5(%arg0: i32, %arg1: i32) -> (i32, i32, i32) {
    %c0_i32 = arith.constant 0 : i32
    %c0_i32_0 = arith.constant 0 : i32
    %c0_i32_1 = arith.constant 0 : i32
    return %arg0, %c0_i32, %c0_i32_0 : i32, i32, i32
  }
}

</mosaic_0001>

<bundles_post_ra>
// kernel: tpu_custom_call.1
= control target key start
LH: loop header
LB: loop body
LE: loop exit
PB: predicated region body
PF: predicated region fallthrough
CT: control target
= control target key end

     0   :  { %s1625_s0 = inlined_call_operand.<no memory space> [shape: f32[1], index: 0, kind: input, shape index: {}]   ;;  %s1626_s1 = inlined_call_operand.vmem [shape: f32[1,256], index: 1, kind: input, shape index: {}]   ;;  %s1627_s2 = inlined_call_operand.hbm [shape: f32[4,32,256], index: 2, kind: input, shape index: {}]   ;;  %s1628_s3 = inlined_call_operand.hbm [shape: f32[2,32,256], index: 3, kind: input, shape index: {}]   ;;  %s1629_s4 = inlined_call_operand.hbm [shape: f32[2,1,128], index: 4, kind: output, shape index: {0}]   ;;  %s1630_s5 = inlined_call_operand.hbm [shape: f32[2,1,256], index: 5, kind: output, shape index: {1}]  }
   0x1   :  { %1639 = sst [smem:[#allocation25_spill]] %s1627_s2 }
   0x2   :  { %11 = sst [smem:[#allocation5]] %s1625_s0 }
   0x3   :  { %12 = vsyncpa [#allocation7], 0 }
   0x4   :  { %14 = vsyncpa [#allocation7 + $0x1], 0 }
   0x5   :  { %15 = vsyncpa [#allocation10], 0 }
   0x6   :  { %17 = vsyncpa [#allocation10 + $0x1], 0 }
   0x7   :  { %18 = vsyncpa [#allocation8], 0 }
   0x8   :  { %20 = vsyncpa [#allocation8 + $0x1], 0 }
   0x9   :  { %21 = vsyncpa [#allocation13], 0 }
   0xa   :  { %23 = vsyncpa [#allocation13 + $0x1], 0  ;;  %s1227_s20 = smov 0   ;;  %s1229_s21 = smov 0  }
   0xb   :  { %s1231_s22 = smov 0   ;;  %s1233_s23 = smov 0  }
   0xc   :  { %s1235_s24 = smov 0   ;;  %s1237_s25 = smov 0  }
   0xd   :  { %s1239_s0 = smov 0   ;;  %s1241_s26 = smov 0  }
   0xe   :  { %s1243_s27 = smov 0   ;;  %s1245_s28 = smov 0  }
   0xf   :  { %s1247_s29 = smov 0  }
  0x10 LB: > { %1640 = sst [smem:[#allocation18_spill]] %s1163_s25  ;;  %s768_s30 = sadd.s32 4294967295, %s1183_s29   ;;  %s1183_s29 = sphi %s1247_s29, %s29_s29   ;;  %s1179_s28 = sphi %s1245_s28, %s1666_s28   ;;  %s1175_s27 = sphi %s1243_s27, %s1665_s27   ;;  %s1171_s26 = sphi %s1241_s26, %s1664_s26   ;;  %s1167_s0 = sphi %s1239_s0, %s1663_s0   ;;  %s1163_s25 = sphi %s1237_s25, %s1662_s25   ;;  %s1159_s24 = sphi %s1235_s24, %s1671_s24   ;;  %s1155_s23 = sphi %s1233_s23, %s1670_s23   ;;  %s1151_s22 = sphi %s1231_s22, %s1669_s22   ;;  %s1147_s21 = sphi %s1229_s21, %s1668_s21   ;;  %s1143_s20 = sphi %s1227_s20, %s1667_s20  }
  0x11   : > { %1641 = sst [smem:[#allocation19_spill]] %s1175_s27  ;;  %s769_s6 = sadd.s32 4294967294, %s1183_s29  }
  0x12   : > { %1642 = sst [smem:[#allocation20_spill]] %s1179_s28  ;;  %s38_s7 = sadd.s32 1, %s1175_s27 }
  0x13   : > { %s41_s8 = sadd.s32 1, %s1179_s28  ;;  %p39_p0 = scmp.ge.s32.totalorder %s38_s7, 2 }
  0x14   : > { %s770_s9 = sshll.u32 %s1179_s28, 1  ;;  %s94_s11 = sadd.s32 1, %s1163_s25 }
  0x15   : > { %s1286_s10 = sadd.s32 %s1175_s27, %s770_s9  ;;  %s1673_s7 = smov (%p39_p0, %s38_s7), 0 }
  0x16   : > { %1643 = sst [smem:[#allocation21_spill]] %s1673_s7  ;;  %s1675_s8 = smov (!%p39_p0, %s41_s8), %s1179_s28 }
  0x17   : > { %p101_p1 = scmp.ne.s32.totalorder %s1163_s25, %s1159_s24  ;;  %p102_p2 = scmp.eq.s32.totalorder %s1183_s29, 0 }
  0x18   : > { %p43_p3 = scmp.ge.s32.totalorder %s1675_s8, 2  ;;  %p107_p4 = scmp.ne.s32.totalorder %s1159_s24, %s1155_s23 }
  0x19   : > { %p1296_p5 = por %p102_p2, %p101_p1  ;;  %p108_p6 = scmp.eq.s32.totalorder %s768_s30, 0 }
  0x1a   : > { %s1677_s8 = smov (%p43_p3, %s1675_s8), 0  ;;  %s150_s14 = sadd.s32 1, %s1151_s22 }
  0x1b   : > { %1645 = sst [smem:[#allocation22_spill]] %s1677_s8  ;;  %p1302_p7 = por %p108_p6, %p107_p4 }
  0x1c   : > { %s771_s15 = sshll.u32 %s1677_s8, 1  ;;  %s147_s16 = ssub.s32 %s1179_s28, %s1677_s8 }
  0x1d   : > { %s1646_s13 = scalar_select %p1302_p7, 1, 0 }
  0x1e   : > { %s90_s17 = sadd.s32 %s771_s15, %s1673_s7  ;;  %p148_p8 = scmp.eq.s32.totalorder %s147_s16, 0 }
  0x1f   : > { %s91_s18 = ssub.s32 %s1286_s10, %s90_s17  ;;  %p160_p9 = scmp.ne.s32.totalorder %s1151_s22, %s1147_s21 }
  0x20   : > { %p92_p10 = scmp.eq.s32.totalorder %s91_s18, 0  ;;  %p161_p11 = scmp.eq.s32.totalorder %s768_s30, 3 }
  0x21   : > { %s1315_s19 = scalar_select %p148_p8, %s1151_s22, %s150_s14  }
  0x22   : > { %s1318_s23 = scalar_select %p92_p10, %s1163_s25, %s94_s11  }
  0x23   : > { %1647 = sst [smem:[#allocation23_spill]] %s1315_s19  ;;  %p1320_p12 = por %p161_p11, %p160_p9 }
  0x24   : > { %1648 = sst [smem:[#allocation24_spill]] %s1318_s23  ;;  %p166_p13 = scmp.ne.s32.totalorder %s1147_s21, %s1143_s20 }
  0x25   : > { %s1649_s9 = scalar_select %p1320_p12, 1, 0 }
  0x26   : > { %p167_p0 = scmp.eq.s32.totalorder %s769_s6, 3  ;;  %p832_p1 = scmp.lt.s32.totalorder %s1183_s29, 4 }
  0x27   : > { %s1330_s15 = sand.u32 1, %s1163_s25   ;;  %s1634_s14 = sshll.u32 %s1286_s10, 8 }
  0x28   : > { %p1332_p2 = por %p167_p0, %p166_p13  ;;  %s776_s30 = sshll.u32 %s1330_s15, 6 }
  0x29   : > { %s1651_s2 = sld [smem:[#allocation25_spill]]  ;;  %s223_s6 = scalar_lea.vmem [#allocation6], %s776_s30 }
  0x2a   : > { %s1650_s16 = scalar_select %p1332_p2, 1, 0 }
  0x2b   : > { %s232_s8 = sshll.u32 %s223_s6, 4  ;;  %p1347_p3 = pnand %p832_p1, %p1296_p5  ;;  %s1351_s8 = int_to_ptr.vmem [resolvable:$true] %s232_s8 }
  0x2d   : > { %p967_p8 = pneg %p1347_p3 }
  0x2f   : > { %s1343_s18 = scalar_lea.hbm %s1651_s2, %s1634_s14  ;;  %s970_s17 = scalar_lea.hbm %s1651_s2, 4096 }
  0x30   : > { %s965_s11 = scalar_lea.hbm %s1343_s18, 1024  ;;  %p971_p5 = scmp.lt.u32.totalorder %s1343_s18, %s1651_s2 }
  0x31   : > { %p966_p6 = scmp.ne.s32.totalorder %s1343_s18, %s965_s11  ;;  %p972_p11 = scmp.lt.u32.totalorder %s970_s17, %s965_s11 }
  0x32   : > { %p974_p0 = scmp.lt.u32.totalorder %s965_s11, %s1343_s18 }
  0x33   : > { %p968_p9 = pnand %p967_p8, %p966_p6  ;;  %p973_p13 = por %p972_p11, %p971_p5 }
  0x35   : > { %p969_p10 = pneg %p968_p9  ;;  %p975_p1 = por %p974_p0, %p973_p13 }
  0x37   : > { %p976_p4 = pnand %p975_p1, %p969_p10 }
  0x39   : > { %979 = shalt.err (!%p976_p4)
}
  0x3a   : > { %s980_s28 = scalar_lea.vmem %s1351_s8, 1024  ;;  %s1185_s30 = smov [#allocation6]  }
  0x3b   : > { %p981_p6 = scmp.ne.s32.totalorder %s1351_s8, %s980_s28  ;;  %s985_s12 = sshll.u32 %s1185_s30, 4  ;;  %s986_s12 = int_to_ptr.vmem [resolvable:$false] %s985_s12 }
  0x3c   : > { %s987_s14 = scalar_lea.vmem %s986_s12, 2048  ;;  %p988_p12 = scmp.lt.s32.totalorder %s1351_s8, %s986_s12 }
  0x3d   : > { %p983_p9 = pnand %p981_p6, %p967_p8  ;;  %p989_p5 = scmp.lt.s32.totalorder %s987_s14, %s980_s28 }
  0x3f   : > { %p984_p2 = pneg %p983_p9  ;;  %p990_p11 = por %p989_p5, %p988_p12 }
  0x41   : > { %p991_p13 = pnand %p990_p11, %p984_p2 }
  0x43   : > { %994 = shalt.err (!%p991_p13)
}
  0x44   : > { %s1186_s11 = smov 1024   ;;  %s1187_s17 = smov 256  }
  0x45   : > { %s1188_s6 = smov 16   ;;  %s1653_s28 = scalar_lea.sflag [#allocation7], %s1330_s15 }
  0x46   : > { %821 = dma.hbm_to_vmem [thread:$0]  (!%p1347_p3), %s1343_s18, 1024, %s1351_s8, %s1653_s28, %s1186_s11, %s1187_s17, %s1188_s6  }
  0x47   : > { %p263_p12 = scmp.lt.s32.totalorder %s1183_s29, 5  ;;  %s780_s30 = sshll.u32 %s1330_s15, 5 }
  0x48   : > { %s1654_s12 = sshll.u32 %s1286_s10, 8  ;;  %p1655_p2 = scmp.ge.s32.totalorder %s1183_s29, 1 }
  0x49   : > { %s1392_s27 = scalar_lea.hbm %s1628_s3, %s1654_s12  ;;  %s246_s25 = scalar_lea.vmem [#allocation9], %s780_s30 }
  0x4a   : > { %p1396_p4 = pnand %p1655_p2, %p263_p12  ;;  %s255_s19 = sshll.u32 %s246_s25, 4  ;;  %s1400_s19 = int_to_ptr.vmem [resolvable:$true] %s255_s19 }
  0x4b   : > { %s243_s8 = scalar_lea.sflag [#allocation10], %s1330_s15  ;;  %s995_s10 = scalar_lea.hbm %s1392_s27, 512 }
  0x4c   : > { %p996_p10 = scmp.ne.s32.totalorder %s1392_s27, %s995_s10  ;;  %s1000_s28 = scalar_lea.hbm %s1628_s3, 2048 }
  0x4d   : > { %p1001_p6 = scmp.lt.u32.totalorder %s1392_s27, %s1628_s3  ;;  %p1002_p9 = scmp.lt.u32.totalorder %s1000_s28, %s995_s10 }
  0x4e   : > { %p998_p0 = pnand %p996_p10, %p967_p8  ;;  %p1004_p11 = scmp.lt.u32.totalorder %s995_s10, %s1392_s27 }
  0x4f   : > { %p1003_p5 = por %p1002_p9, %p1001_p6 }
  0x50   : > { %p999_p1 = pneg %p998_p0 }
  0x51   : > { %p1005_p13 = por %p1004_p11, %p1003_p5 }
  0x53   : > { %p1006_p12 = pnand %p1005_p13, %p999_p1 }
  0x55   : > { %1009 = shalt.err (!%p1006_p12)
}
  0x56   : > { %s1010_s25 = scalar_lea.vmem %s1400_s19, 512  ;;  %s1189_s30 = smov [#allocation9]  }
  0x57   : > { %p1011_p2 = scmp.ne.s32.totalorder %s1400_s19, %s1010_s25  ;;  %s1015_s2 = sshll.u32 %s1189_s30, 4  ;;  %s1016_s2 = int_to_ptr.vmem [resolvable:$false] %s1015_s2 }
  0x58   : > { %s1017_s18 = scalar_lea.vmem %s1016_s2, 1024  ;;  %p1018_p7 = scmp.lt.s32.totalorder %s1400_s19, %s1016_s2 }
  0x59   : > { %p1013_p10 = pnand %p1011_p2, %p967_p8  ;;  %p1019_p6 = scmp.lt.s32.totalorder %s1017_s18, %s1010_s25 }
  0x5b   : > { %p1014_p0 = pneg %p1013_p10  ;;  %p1020_p9 = por %p1019_p6, %p1018_p7 }
  0x5d   : > { %p1021_p5 = pnand %p1020_p9, %p1014_p0 }
  0x5f   : > { %1024 = shalt.err (!%p1021_p5)
}
  0x60   : > { %824 = dma.hbm_to_vmem [thread:$0]  (!%p1347_p3), %s1392_s27, 512, %s1400_s19, %s243_s8, %s1186_s11, %s1187_s17, %s1188_s6  }
  0x61   : > { %267 = sbr.rel (%p1396_p4) target bundleno = 736 (0x2e0), region = 36  ;;  %s269_s10 = sand.u32 (!%p1396_p4), 1, %s1159_s24  }
  0x62   : > { %s785_s28 = sshll.u32 (!%p1396_p4), %s269_s10, 6  ;;  %s270_s12 = scalar_lea.sflag (!%p1396_p4), [#allocation7], %s269_s10 }
  0x63   : > { %s1434_s14 = scalar_lea.vmem (!%p1396_p4), [#allocation6], %s785_s28  ;;  %p1657_p7 = scmp.ne.s32.totalorder (!%p1396_p4), %s1646_s13, 0 }
  0x68   : > { %1126 = dma.done.wait (%p1657_p7), %s270_s12, 1024  }
  0x69   : > { %1128 = vsyncadd (%p1657_p7), %s270_s12, 4294966272  ;;  %s786_s7 = sshll.u32 %s269_s10, 5  ;;  %s279_s15 = scalar_lea.sflag [#allocation10], %s269_s10 }
  0x6a   : > { %s1440_s25 = scalar_lea.vmem [#allocation9], %s786_s7 }
  0x6b   : > { %1130 = dma.done.wait (%p1657_p7), %s279_s15, 512  }
  0x6c   : > { %1132 = vsyncadd (%p1657_p7), %s279_s15, 4294966784  ;;  %s1447_s27 = sand.u32 1, %s1147_s21   ;;  %p788_p3 = scmp.ne.s32.totalorder %s1167_s0, 0 }
  0x6d   : > { %s787_s19 = sshll.u32 %s1447_s27, 1  ;;  %s1451_s23 = scalar_lea.vmem [#allocation11], %s1447_s27  ;;  %v327_v0 = vlaneseq (!%p788_p3)  ;;  %v1190_v1 = vmov (!%p788_p3), 0.0  }
  0x6e   : > { %s1453_s11 = scalar_lea.vmem [#allocation12], %s787_s19  ;;  %325 = sbr.rel (%p788_p3) target bundleno = 117 (0x75), region = 48  ;;  %326 = vst [vmem:[%s1451_s23] sm:$0x1] (!%p788_p3), %v1190_v1 }
  0x6f   : > { %vm329_vm0 = vcmp.lt.s32.totalorder (!%p788_p3), %v327_v0, 256 }
  0x70   : > { %331 = vst.msk [vmem:[%s1453_s11] sm:$0x3] (!%p788_p3), %vm329_vm0, %v1190_v1 }
  0x75 PF: > { %v376_v2 = vld [vmem:[%s1434_s14] sm:$0xff]  ;;  %v377_v3 = vld [vmem:[%s1434_s14 + $0x8] sm:$0xff]  ;;  %s332_s0 = sld [smem:[#allocation5]]  ;;  %v791_v9 = vld [vmem:[%s1434_s14 + $0x10] sm:$0xff]  ;;  %v346_v24 = vlaneseq  ;;  %s805_s8 = sshll.u32 %s1171_s26, 5 }
  0x76   : > { %v793_v4 = vld [vmem:[%s1434_s14 + $0x20] sm:$0xff]  ;;  %v378_v5 = vmul.f32 10.0, %v376_v2  ;;  %v379_v6 = vmul.f32 10.0, %v377_v3  ;;  %v794_v7 = vld [vmem:[%s1434_s14 + $0x28] sm:$0xff]  ;;  %v792_v10 = vld [vmem:[%s1434_s14 + $0x18] sm:$0xff]  ;;  %v441_v12 = vmul.f32 10.0, %v791_v9  ;;  %s1535_s10 = scalar_lea.hbm %s1630_s5, %s805_s8 }
  0x77   : > { %v484_v8 = vmul.f32 10.0, %v793_v4  ;;  %v485_v11 = vmul.f32 10.0, %v794_v7  ;;  %v442_v13 = vmul.f32 10.0, %v792_v10  ;;  %v795_v14 = vld [vmem:[%s1434_s14 + $0x30] sm:$0xff]  ;;  %v796_v15 = vld [vmem:[%s1434_s14 + $0x38] sm:$0xff]  ;;  %v1467_v25 = vshrl.u32 %v346_v24, 7 }
  0x78   : > { %v380_v16 = vmax.f32 %v378_v5, %v379_v6  ;;  %v511_v17 = vmul.f32 10.0, %v795_v14  ;;  %v512_v18 = vmul.f32 10.0, %v796_v15  ;;  %v336_v28 = vld [vmem:[%s1626_s1] sm:$0x3]  ;;  %v1475_v31 = vld [vmem:[%s1440_s25 + $0x10] sm:$0xff]  ;;  %v1478_v32 = vld [vmem:[%s1440_s25 + $0x18] sm:$0xff] }
  0x79   : > { %v486_v19 = vmax.f32 %v484_v8, %v485_v11  ;;  %v443_v20 = vmax.f32 %v441_v12, %v442_v13  ;;  %v348_v26 = vsub.s32 0, %v1467_v25  ;;  %v352_v27 = vsub.s32 1, %v1467_v25  ;;  %v1481_v33 = vld [vmem:[%s1440_s25] sm:$0xff]  ;;  %v1484_v34 = vld [vmem:[%s1440_s25 + $0x8] sm:$0xff]  ;;  %s632_s30 = sshll.u32 %s1453_s11, 4  ;;  %s605_s28 = scalar_lea.sflag [#allocation13], %s1447_s27  ;;  %s633_s30 = int_to_ptr.vmem [resolvable:$true] %s632_s30 }
  0x7a   : > { %381 = vmax.xlane.f32.xlu0 %v380_v16  ;;  %v513_v21 = vmax.f32 %v511_v17, %v512_v18  ;;  %vm597_vm1 = vcmp.lt.s32.totalorder %v346_v24, 256  ;;  %s1025_s12 = scalar_lea.vmem %s633_s30, 32  ;;  %p1658_p4 = scmp.ne.s32.totalorder %s1649_s9, 0 }
  0x7b   : > { %487 = vmax.xlane.f32.xlu1 %v486_v19  ;;  %v333_v22 = vstv %s332_s0  ;;  %v349_v29 = vrot.slane %v336_v28, %v348_v26  ;;  %v353_v30 = vrot.slane %v336_v28, %v352_v27  ;;  %p1026_p8 = scmp.ne.s32.totalorder %s633_s30, %s1025_s12  ;;  %s1192_s14 = smov [#allocation12]  }
  0x7c   : > { %927 = vrcp.f32 %v333_v22  ;;  %s1029_s7 = sshll.u32 %s1192_s14, 4  ;;  %s1030_s7 = int_to_ptr.vmem [resolvable:$false] %s1029_s7 }
  0x7d   : > { %v419_v35 = vsub.f32 %v1475_v31, %v349_v29  ;;  %v420_v36 = vsub.f32 %v1478_v32, %v353_v30  ;;  %v356_v37 = vsub.f32 %v1481_v33, %v349_v29  ;;  %v357_v38 = vsub.f32 %v1484_v34, %v353_v30  ;;  %p1027_p1 = pnand %p1026_p8, %p1658_p4  ;;  %s1031_s15 = scalar_lea.vmem %s1030_s7, 64 }
  0x7e   : > { %444 = vmax.xlane.f32.xlu0 %v443_v20  ;;  %p1032_p13 = scmp.lt.s32.totalorder %s633_s30, %s1030_s7  ;;  %p1033_p12 = scmp.lt.s32.totalorder %s1031_s15, %s1025_s12 }
  0x7f   : > { %514 = vmax.xlane.f32.xlu1 %v513_v21  ;;  %p1028_p11 = pneg %p1027_p1 }
  0x80   : > { %p1034_p2 = por %p1033_p12, %p1032_p13 }
  0x82   : > { %p1035_p10 = pnand %p1034_p2, %p1028_p11 }
  0x86   : > { %v928_v23 = vpop.eup %927 }
  0x87   : > { %806 = vpush %v928_v23 }
  0xb8   : > { %s807_s6 = spop %806 }
  0xb9   : > { %v358_v39 = vstv %s807_s6 }
  0xba   : > { %v421_v40 = vmul.f32 %v419_v35, %v358_v39  ;;  %v422_v41 = vmul.f32 %v420_v36, %v358_v39  ;;  %v359_v42 = vmul.f32 %v358_v39, %v356_v37  ;;  %v360_v43 = vmul.f32 %v358_v39, %v357_v38 }
  0xbc   : > { %v423_v44 = vmax.f32 %v421_v40, %v422_v41  ;;  %v361_v45 = vmax.f32 %v359_v42, %v360_v43 }
  0xbe   : > { %424 = vmax.xlane.f32.xlu1 %v423_v44  ;;  %362 = vmax.xlane.f32.xlu0 %v361_v45 }
 0x107   : > { %v382_v46 = vpop.xlane.xlu0 %381 }
 0x108   : > { %v1490_v47 = vsub.f32 %v378_v5, %v382_v46  ;;  %v1492_v48 = vsub.f32 %v379_v6, %v382_v46  ;;  %v488_v49 = vpop.xlane.xlu1 %487 }
 0x109   : > { %v1494_v50 = vsub.f32 %v484_v8, %v488_v49  ;;  %v1496_v51 = vsub.f32 %v485_v11, %v488_v49 }
 0x10a   : > { %v385_v52 = vmul.f32 1.442695, %v1490_v47  ;;  %v387_v53 = vmul.f32 1.442695, %v1492_v48 }
 0x10b   : > { %v491_v54 = vmul.f32 1.442695, %v1494_v50  ;;  %v493_v55 = vmul.f32 1.442695, %v1496_v51  ;;  %v445_v56 = vpop.xlane.xlu0 %444 }
 0x10c   : > { %929 = vpow2.f32 %v385_v52  ;;  %v1502_v57 = vsub.f32 %v441_v12, %v445_v56  ;;  %v1504_v58 = vsub.f32 %v442_v13, %v445_v56  ;;  %v515_v59 = vpop.xlane.xlu1 %514 }
 0x10d   : > { %931 = vpow2.f32 %v387_v53  ;;  %v1506_v60 = vsub.f32 %v511_v17, %v515_v59  ;;  %v1508_v61 = vsub.f32 %v512_v18, %v515_v59 }
 0x10e   : > { %933 = vpow2.f32 %v491_v54  ;;  %v448_v62 = vmul.f32 1.442695, %v1502_v57  ;;  %v450_v63 = vmul.f32 1.442695, %v1504_v58 }
 0x10f   : > { %935 = vpow2.f32 %v493_v55  ;;  %v518_v0 = vmul.f32 1.442695, %v1506_v60  ;;  %v520_v1 = vmul.f32 1.442695, %v1508_v61 }
 0x110   : > { %937 = vpow2.f32 %v448_v62 }
 0x111   : > { %939 = vpow2.f32 %v450_v63 }
 0x112   : > { %941 = vpow2.f32 %v518_v0 }
 0x113   : > { %943 = vpow2.f32 %v520_v1 }
 0x116   : > { %v930_v2 = vpop.eup %929 }
 0x117   : > { %v932_v3 = vpop.eup %931 }
 0x118   : > { %v934_v4 = vpop.eup %933  ;;  %v389_v5 = vadd.f32 %v932_v3, %v930_v2 }
 0x119   : > { %v936_v6 = vpop.eup %935 }
 0x11a   : > { %v938_v7 = vpop.eup %937  ;;  %390 = vadd.xlane.f32.xlu0 %v389_v5  ;;  %v495_v8 = vadd.f32 %v936_v6, %v934_v4 }
 0x11b   : > { %v940_v9 = vpop.eup %939 }
 0x11c   : > { %v942_v10 = vpop.eup %941  ;;  %v452_v11 = vadd.f32 %v940_v9, %v938_v7 }
 0x11d   : > { %v944_v12 = vpop.eup %943 }
 0x11e   : > { %453 = vadd.xlane.f32.xlu1 %v452_v11  ;;  %496 = vadd.xlane.f32.xlu0 %v495_v8  ;;  %v522_v13 = vadd.f32 %v944_v12, %v942_v10 }
 0x122   : > { %523 = vadd.xlane.f32.xlu1 %v522_v13 }
 0x14b   : > { %v425_v14 = vpop.xlane.xlu1 %424  ;;  %v363_v15 = vpop.xlane.xlu0 %362 }
 0x14c   : > { %v426_v16 = vsub.f32 %v421_v40, %v425_v14  ;;  %v427_v17 = vsub.f32 %v422_v41, %v425_v14  ;;  %v364_v18 = vsub.f32 %v359_v42, %v363_v15  ;;  %v365_v19 = vsub.f32 %v360_v43, %v363_v15 }
 0x14e   : > { %v428_v20 = vmul.f32 1.442695, %v426_v16  ;;  %v430_v21 = vmul.f32 1.442695, %v427_v17  ;;  %v366_v22 = vmul.f32 1.442695, %v364_v18 }
 0x14f   : > { %v368_v23 = vmul.f32 1.442695, %v365_v19  ;;  %v562_v19 = vadd.f32 %v1475_v31, %v1481_v33 }
 0x150   : > { %945 = vpow2.f32 %v428_v20  ;;  %v569_v20 = vadd.f32 %v1478_v32, %v1484_v34 }
 0x151   : > { %947 = vpow2.f32 %v430_v21  ;;  %v563_v21 = vrot.slane %v562_v19, 4 }
 0x152   : > { %949 = vpow2.f32 %v366_v22  ;;  %v570_v22 = vrot.slane %v569_v20, 4 }
 0x153   : > { %951 = vpow2.f32 %v368_v23  ;;  %v564_v23 = vadd.f32 %v563_v21, %v562_v19 }
 0x15a   : > { %v946_v26 = vpop.eup %945 }
 0x15b   : > { %v948_v27 = vpop.eup %947 }
 0x15c   : > { %v950_v28 = vpop.eup %949  ;;  %v432_v29 = vadd.f32 %v948_v27, %v946_v26 }
 0x15d   : > { %v952_v30 = vpop.eup %951 }
 0x15e   : > { %433 = vadd.xlane.f32.xlu1 %v432_v29  ;;  %v370_v35 = vadd.f32 %v952_v30, %v950_v28 }
 0x160   : > { %371 = vadd.xlane.f32.xlu0 %v370_v35 }
 0x1a7   : > { %v391_v36 = vpop.xlane.xlu0 %390 }
 0x1ab   : > { %v454_v37 = vpop.xlane.xlu1 %453  ;;  %v497_v38 = vpop.xlane.xlu0 %496 }
 0x1ac   : > { %953 = vlog2.f32 %v454_v37  ;;  %v1191_v37 = vmov 1966171168  }
 0x1ad   : > { %955 = vlog2.f32 %v391_v36 }
 0x1ae   : > { %957 = vlog2.f32 %v497_v38  ;;  %v580_v38 = vunpack.c.l.s4 %v1191_v37 }
 0x1af   : > { %v524_v39 = vpop.xlane.xlu1 %523 }
 0x1b0   : > { %959 = vlog2.f32 %v524_v39  ;;  %v581_v32 = vunpack.c.0.s8 %v580_v38 }
 0x1b2   : > { %v584_v39 = vsub.s32 %v581_v32, %v1467_v25 }
 0x1b6   : > { %v954_v40 = vpop.eup %953 }
 0x1b7   : > { %v956_v41 = vpop.eup %955  ;;  %v456_v42 = vmul.f32 0.6931472, %v954_v40 }
 0x1b8   : > { %v393_v44 = vmul.f32 0.6931472, %v956_v41  ;;  %v958_v45 = vpop.eup %957 }
 0x1b9   : > { %v457_v49 = vsub.f32 %v456_v42, %v1502_v57  ;;  %v458_v52 = vsub.f32 %v456_v42, %v1504_v58  ;;  %v499_v56 = vmul.f32 0.6931472, %v958_v45  ;;  %v557_v42 = vld [vmem:[%s1453_s11] sm:$0x3] }
 0x1ba   : > { %v960_v53 = vpop.eup %959  ;;  %v394_v54 = vsub.f32 %v393_v44, %v1490_v47  ;;  %v395_v55 = vsub.f32 %v393_v44, %v1492_v48 }
 0x1bb   : > { %v526_v63 = vmul.f32 0.6931472, %v960_v53  ;;  %v500_v0 = vsub.f32 %v499_v56, %v1494_v50  ;;  %v501_v1 = vsub.f32 %v499_v56, %v1496_v51 }
 0x1bc   : > { %v467_v59 = vadd.f32 %v457_v49, %v394_v54  ;;  %v468_v62 = vadd.f32 %v458_v52, %v395_v55 }
 0x1bd   : > { %v527_v57 = vsub.f32 %v526_v63, %v1506_v60  ;;  %v528_v58 = vsub.f32 %v526_v63, %v1508_v61 }
 0x1be   : > { %v502_v3 = vadd.f32 %v500_v0, %v467_v59  ;;  %v503_v4 = vadd.f32 %v501_v1, %v468_v62 }
 0x1c0   : > { %v529_v10 = vadd.f32 %v527_v57, %v502_v3  ;;  %v530_v11 = vadd.f32 %v528_v58, %v503_v4 }
 0x1eb   : > { %v434_v43 = vpop.xlane.xlu1 %433 }
 0x1ec   : > { %961 = vrcp.f32 %v434_v43 }
 0x1ed   : > { %v372_v46 = vpop.xlane.xlu0 %371 }
 0x1ee   : > { %963 = vrcp.f32 %v372_v46 }
 0x1f6   : > { %v962_v2 = vpop.eup %961 }
 0x1f7   : > { %v436_v5 = vmul.f32 %v962_v2, %v946_v26  ;;  %v437_v6 = vmul.f32 %v962_v2, %v948_v27  ;;  %v571_v26 = vadd.f32 %v570_v22, %v569_v20  ;;  %v565_v27 = vrot.slane %v564_v23, 2 }
 0x1f8   : > { %v964_v47 = vpop.eup %963 }
 0x1f9   : > { %v374_v7 = vmul.f32 %v964_v47, %v950_v28  ;;  %v375_v48 = vmul.f32 %v964_v47, %v952_v30  ;;  %v473_v8 = vmul.f32 %v457_v49, %v436_v5  ;;  %v474_v9 = vmul.f32 %v458_v52, %v437_v6 }
 0x1fa   : > { %v572_v28 = vrot.slane %v571_v26, 2  ;;  %v566_v29 = vadd.f32 %v565_v27, %v564_v23 }
 0x1fb   : > { %v410_v12 = vmul.f32 %v394_v54, %v374_v7  ;;  %v411_v50 = vmul.f32 %v395_v55, %v375_v48  ;;  %v461_v13 = vadd.f32 %v436_v5, %v374_v7  ;;  %v462_v51 = vadd.f32 %v437_v6, %v375_v48 }
 0x1fc   : > { %v573_v30 = vadd.f32 %v572_v28, %v571_v26  ;;  %v567_v35 = vrot.slane %v566_v29, 1 }
 0x1fd   : > { %v475_v14 = vadd.f32 %v473_v8, %v410_v12  ;;  %v476_v15 = vadd.f32 %v474_v9, %v411_v50  ;;  %v537_v16 = vmul.f32 %v529_v10, %v461_v13  ;;  %v538_v17 = vmul.f32 %v530_v11, %v462_v51 }
 0x1fe   : > { %v574_v36 = vrot.slane %v573_v30, 1  ;;  %v568_v31 = vadd.f32 %v567_v35, %v566_v29 }
 0x1ff   : > { %v541_v60 = vsub.f32 %v537_v16, %v475_v14  ;;  %v542_v18 = vsub.f32 %v538_v17, %v476_v15 }
 0x200   : > { %v575_v33 = vadd.f32 %v574_v36, %v573_v30 }
 0x201   : > { %v543_v61 = vadd.f32 %v542_v18, %v541_v60 }
 0x202   : > { %v578_v34 = vcombine.low %v568_v31, %v575_v33 }
 0x203   : > { %544 = vadd.xlane.f32.xlu0 %v543_v61 }
 0x204   : > { %v585_v40 = vrot.slane %v578_v34, %v584_v39 }
 0x206   : > { %v592_v41 = vrot.slane %v585_v40, %v584_v39 }
 0x208   : > { %v594_v43 = vadd.f32 %v592_v41, %v557_v42 }
 0x20a   : > { %599 = vst.msk [vmem:[%s1453_s11] sm:$0x3] %vm597_vm1, %v594_v43 }
 0x20b   : > { %1038 = shalt.err (!%p1035_p10)
}
 0x20c   : > { %s1039_s25 = scalar_lea.hbm %s1535_s10, 32  ;;  %s1043_s0 = scalar_lea.hbm %s1630_s5, 64 }
 0x20d   : > { %p1040_p0 = scmp.ne.s32.totalorder %s1535_s10, %s1039_s25  ;;  %p1044_p5 = scmp.lt.u32.totalorder %s1535_s10, %s1630_s5 }
 0x20e   : > { %p1045_p7 = scmp.lt.u32.totalorder %s1043_s0, %s1039_s25  ;;  %p1047_p8 = scmp.lt.u32.totalorder %s1039_s25, %s1535_s10 }
 0x20f   : > { %p1041_p6 = pnand %p1040_p0, %p1658_p4 }
 0x210   : > { %p1046_p3 = por %p1045_p7, %p1044_p5 }
 0x211   : > { %p1042_p9 = pneg %p1041_p6 }
 0x212   : > { %p1048_p1 = por %p1047_p8, %p1046_p3 }
 0x214   : > { %p1049_p11 = pnand %p1048_p1, %p1042_p9 }
 0x216   : > { %1052 = shalt.err (!%p1049_p11)
}
 0x217   : > { %815 = dma.vmem_to_hbm [thread:$0]  (%p1658_p4), %s633_s30, 32, %s1535_s10, %s605_s28   ;;  %v553_v53 = vld [vmem:[%s1451_s23] sm:$0x1] }
 0x218   : > { %s798_s6 = sshll.u32 %s1171_s26, 4  ;;  %s618_s8 = sshll.u32 %s1451_s23, 4  ;;  %s1563_s8 = int_to_ptr.vmem [resolvable:$true] %s618_s8 }
 0x219   : > { %s1561_s30 = scalar_lea.hbm %s1629_s4, %s798_s6  ;;  %s601_s10 = scalar_lea.sflag [#allocation8], %s1447_s27 }
 0x21a   : > { %s1053_s28 = scalar_lea.vmem %s1563_s8, 16  ;;  %s1193_s26 = smov [#allocation11]  }
 0x21b   : > { %p1054_p13 = scmp.ne.s32.totalorder %s1563_s8, %s1053_s28  ;;  %s1057_s14 = sshll.u32 %s1193_s26, 4  ;;  %s1058_s14 = int_to_ptr.vmem [resolvable:$false] %s1057_s14 }
 0x21c   : > { %s1059_s7 = scalar_lea.vmem %s1058_s14, 32  ;;  %p1060_p10 = scmp.lt.s32.totalorder %s1563_s8, %s1058_s14 }
 0x21d   : > { %p1055_p12 = pnand %p1054_p13, %p1658_p4  ;;  %p1061_p0 = scmp.lt.s32.totalorder %s1059_s7, %s1053_s28 }
 0x21f   : > { %p1056_p2 = pneg %p1055_p12  ;;  %p1062_p6 = por %p1061_p0, %p1060_p10 }
 0x221   : > { %p1063_p9 = pnand %p1062_p6, %p1056_p2 }
 0x290   : > { %v545_v24 = vpop.xlane.xlu0 %544 }
 0x291   : > { %v546_v25 = vrot.slane %v545_v24, 4 }
 0x293   : > { %v547_v44 = vadd.f32 %v546_v25, %v545_v24 }
 0x295   : > { %v548_v45 = vrot.slane %v547_v44, 2 }
 0x297   : > { %v549_v46 = vadd.f32 %v548_v45, %v547_v44 }
 0x299   : > { %v550_v49 = vrot.slane %v549_v46, 1 }
 0x29b   : > { %v551_v52 = vadd.f32 %v550_v49, %v549_v46 }
 0x29d   : > { %808 = vpush %v551_v52 }
 0x2ce   : > { %s809_s2 = spop %808 }
 0x2cf   : > { %v554_v54 = vstv %s809_s2 }
 0x2d0   : > { %v555_v55 = vadd.f32 %v554_v54, %v553_v53 }
 0x2d2   : > { %556 = vst [vmem:[%s1451_s23] sm:$0x1] %v555_v55 }
 0x2d3   : > { %1066 = shalt.err (!%p1063_p9)
}
 0x2d4   : > { %s1067_s27 = scalar_lea.hbm %s1561_s30, 16  ;;  %s1071_s25 = scalar_lea.hbm %s1629_s4, 32 }
 0x2d5   : > { %p1068_p5 = scmp.ne.s32.totalorder %s1561_s30, %s1067_s27  ;;  %p1072_p8 = scmp.lt.u32.totalorder %s1561_s30, %s1629_s4 }
 0x2d6   : > { %p1073_p1 = scmp.lt.u32.totalorder %s1071_s25, %s1067_s27  ;;  %p1075_p13 = scmp.lt.u32.totalorder %s1067_s27, %s1561_s30 }
 0x2d7   : > { %p1069_p7 = pnand %p1068_p5, %p1658_p4 }
 0x2d8   : > { %p1074_p11 = por %p1073_p1, %p1072_p8 }
 0x2d9   : > { %p1070_p3 = pneg %p1069_p7 }
 0x2da   : > { %p1076_p12 = por %p1075_p13, %p1074_p11 }
 0x2dc   : > { %p1077_p2 = pnand %p1076_p12, %p1070_p3 }
 0x2de   : > { %1080 = shalt.err (!%p1077_p2)
}
 0x2df   : > { %814 = dma.vmem_to_hbm [thread:$0]  (%p1658_p4), %s1563_s8, 16, %s1561_s30, %s601_s10  }
 0x2e0 PF: > { %p833_p10 = scmp.ge.s32.totalorder %s1183_s29, 2  ;;  %s644_s0 = sand.u32 1, %s1143_s20  }
 0x2e1   : > { %p1659_p0 = scmp.ne.s32.totalorder %s1650_s16, 0  ;;  %s645_s13 = scalar_lea.sflag [#allocation8], %s644_s0 }
 0x2e3   : > { %p826_p6 = pnand %p833_p10, %p1659_p0 }
 0x2e5   : > { %1134 = dma.done.wait (!%p826_p6), %s645_s13, 16  }
 0x2e6   : > { %1136 = vsyncadd (!%p826_p6), %s645_s13, 4294967280  ;;  %s653_s17 = scalar_lea.sflag [#allocation13], %s644_s0 }
 0x2e7   : > { %1138 = dma.done.wait (!%p826_p6), %s653_s17, 32  }
 0x2e8   : > { %1140 = vsyncadd (!%p826_p6), %s653_s17, 4294967264  ;;  %s29_s29 = sadd.s32 1, %s1183_s29   ;;  %s1660_s9 = sld [smem:[#allocation23_spill]] }
 0x2e9   : > { %p26_p9 = scmp.ge.s32.totalorder %s29_s29, 6   ;;  %s1661_s6 = sld [smem:[#allocation18_spill]] }
 0x2ea   : > { %s1662_s25 = sld [smem:[#allocation24_spill]]  ;;  %s1663_s0 = sld [smem:[#allocation19_spill]] }
 0x2eb   : > { %s1664_s26 = sld [smem:[#allocation20_spill]]  ;;  %s1665_s27 = sld [smem:[#allocation21_spill]] }
 0x2ec   : > { %s1666_s28 = sld [smem:[#allocation22_spill]]  ;;  %s1667_s20 = smov %s1147_s21 }
 0x2ed   : > { %s1668_s21 = smov %s1151_s22  ;;  %s1670_s23 = smov %s1159_s24 }
 0x2ee   : > { %s1669_s22 = smov %s1660_s9  ;;  %28 = sbr.rel (!%p26_p9) target bundleno = 16 (0x10), region = 119 }
 0x2ef   : > { %s1671_s24 = smov %s1661_s6 }
 0x2f5   :  { %658 = vsyncpa [#allocation7], 1 }
 0x2f6   :  { %660 = vsyncpa [#allocation7 + $0x1], 1 }
 0x2f7   :  { %661 = vsyncpa [#allocation10], 1 }
 0x2f8   :  { %663 = vsyncpa [#allocation10 + $0x1], 1 }
 0x2f9   :  { %664 = vsyncpa [#allocation8], 1 }
 0x2fa   :  { %666 = vsyncpa [#allocation8 + $0x1], 1 }
 0x2fb   :  { %667 = vsyncpa [#allocation13], 1 }
 0x2fc   :  { %669 = vsyncpa [#allocation13 + $0x1], 1 }

</bundles_post_ra>
